<compile_context>
chip_gen: v7x
topology: tpu7x:2x2x1
jax: 0.10.0
libtpu: 0.0.40
codegen_flags: <defaults>
</compile_context>

<pallas_src>
import functools

import jax
import jax.numpy as jnp
from jax import lax
from jax.experimental import pallas as pl
from jax.experimental.pallas import tpu as pltpu

BN_EPS = 1e-5
# bf16 MXU inputs (f32 accumulation inside the kernel): halves HBM bytes for
# the dominant patches operand and doubles MXU throughput on v6e/v7x.
MATMUL_DTYPE = jnp.bfloat16


# ---------------------------------------------------------------------------
# Pallas kernels: tiled matmul + folded-BN shift (+ residual) (+ ReLU)
# ---------------------------------------------------------------------------
def _matmul_shift_kernel(p_ref, w_ref, shift_ref, o_ref, acc_ref, *, relu):
    """acc += p @ w over the k grid axis; epilogue: + shift [, ReLU]."""
    @pl.when(pl.program_id(2) == 0)
    def _():
        acc_ref[...] = jnp.zeros_like(acc_ref)

    acc_ref[...] += jnp.dot(p_ref[...], w_ref[...],
                            preferred_element_type=jnp.float32)

    @pl.when(pl.program_id(2) == pl.num_programs(2) - 1)
    def _():
        y = acc_ref[...] + shift_ref[...]
        if relu:
            y = jnp.maximum(y, 0.0)
        o_ref[...] = y.astype(o_ref.dtype)


def _matmul_shift_res_relu_kernel(p_ref, w_ref, shift_ref, res_ref, o_ref,
                                  acc_ref):
    """acc += p @ w; epilogue: + shift + residual, ReLU (identity shortcut)."""
    @pl.when(pl.program_id(2) == 0)
    def _():
        acc_ref[...] = jnp.zeros_like(acc_ref)

    acc_ref[...] += jnp.dot(p_ref[...], w_ref[...],
                            preferred_element_type=jnp.float32)

    @pl.when(pl.program_id(2) == pl.num_programs(2) - 1)
    def _():
        y = acc_ref[...] + shift_ref[...] + res_ref[...]
        o_ref[...] = jnp.maximum(y, 0.0).astype(o_ref.dtype)


# ---------------------------------------------------------------------------
# Tiled pallas_call wrapper
# ---------------------------------------------------------------------------
def _round_up(x, m):
    return (x + m - 1) // m * m


def _pick_tile(dim, candidates):
    for c in candidates:
        if dim % c == 0:
            return c
    return dim


def _matmul_bias_act(patches, w_scaled, shift, residual=None, *, relu):
    """out = [relu]((patches @ w_scaled) + shift [+ residual]).

    Tiled Pallas matmul with a K-reduction accumulator.  All operands are
    padded to MXU/lane-friendly shapes (last dims multiples of 128); the
    result is sliced back to (M, Cout) in f32.  `w_scaled`/`shift` already
    carry the folded BatchNorm scale/shift.
    """
    M, K = patches.shape
    Cout = w_scaled.shape[1]

    # Tile / pad geometry: lane dims 128-aligned, M a multiple of the M-tile.
    tm = min(512, _round_up(M, 8))          # generation-safe (fits v7x VMEM)
    Mp = _round_up(M, tm)
    Kp = _round_up(K, 128)
    Np = _round_up(Cout, 128)               # lane-dense, unmasked stores
    tk = _pick_tile(Kp, (512, 256, 128))
    tn = _pick_tile(Np, (256, 128))
    grid = (Mp // tm, Np // tn, Kp // tk)   # reduction axis last

    p = jnp.pad(patches, ((0, Mp - M), (0, Kp - K))).astype(MATMUL_DTYPE)
    w = jnp.pad(w_scaled, ((0, Kp - K), (0, Np - Cout))).astype(MATMUL_DTYPE)
    sh = jnp.pad(shift, (0, Np - Cout)).reshape(1, Np).astype(jnp.float32)

    inputs = [p, w, sh]
    in_specs = [
        pl.BlockSpec((tm, tk), lambda i, j, k: (i, k)),
        pl.BlockSpec((tk, tn), lambda i, j, k: (k, j)),
        pl.BlockSpec((1, tn), lambda i, j, k: (0, j)),
    ]
    if residual is not None:
        r = jnp.pad(residual.astype(jnp.float32),
                    ((0, Mp - M), (0, Np - Cout)))
        inputs.append(r)
        in_specs.append(pl.BlockSpec((tm, tn), lambda i, j, k: (i, j)))
        kernel = _matmul_shift_res_relu_kernel
    else:
        kernel = functools.partial(_matmul_shift_kernel, relu=relu)

    # VMEM budget: double-buffered inputs/output + f32 accumulator + headroom.
    eltb = jnp.dtype(MATMUL_DTYPE).itemsize
    need = 2 * (tm * tk + tk * tn) * eltb + 2 * tm * tn * 4 + tm * tn * 4
    if residual is not None:
        need += 2 * tm * tn * 4
    vmem_limit = int(min(max(2 * need, 16 * 1024 * 1024), 48 * 1024 * 1024))

    bytes_accessed = int(sum(int(a.size) * a.dtype.itemsize for a in inputs)
                         + Mp * Np * 4)
    cost = pl.CostEstimate(flops=2 * Mp * Kp * Np, transcendentals=0,
                           bytes_accessed=bytes_accessed)

    out = pl.pallas_call(
        kernel,
        out_shape=jax.ShapeDtypeStruct((Mp, Np), jnp.float32),
        grid=grid,
        in_specs=in_specs,
        out_specs=pl.BlockSpec((tm, tn), lambda i, j, k: (i, j)),
        scratch_shapes=[pltpu.VMEM((tm, tn), jnp.float32)],
        compiler_params=pltpu.CompilerParams(
            dimension_semantics=("parallel", "parallel", "arbitrary"),
            vmem_limit_bytes=vmem_limit,
            # Permit XLA to fuse the im2col producer into the patches operand
            # so the 9x-inflated patch matrix need not be materialized in HBM.
            allow_input_fusion=[True] + [False] * (len(inputs) - 1),
        ),
        cost_estimate=cost,
    )(*inputs)
    return out[:M, :Cout]


# ---------------------------------------------------------------------------
# Glue (im2col, weight/BN reshaping) in plain JAX
# ---------------------------------------------------------------------------
def _extract_patches_nhwc(x_nhwc, ksize, stride, pad):
    """im2col: (N*Ho*Wo, ksize*ksize*C) with (kh, kw, c) minor order."""
    N, H, W, C = x_nhwc.shape
    xp = jnp.pad(x_nhwc, ((0, 0), (pad, pad), (pad, pad), (0, 0)))
    Ho = (H + 2 * pad - ksize) // stride + 1
    Wo = (W + 2 * pad - ksize) // stride + 1
    cols = []
    for dy in range(ksize):
        for dx in range(ksize):
            sl = xp[:, dy:dy + stride * (Ho - 1) + 1:stride,
                    dx:dx + stride * (Wo - 1) + 1:stride, :]
            cols.append(sl)
    patches = jnp.concatenate(cols, axis=-1)
    return patches.reshape(N * Ho * Wo, ksize * ksize * C), (N, Ho, Wo)


def _fold_bn(gamma, beta, mean, var, eps=BN_EPS):
    scale = gamma / jnp.sqrt(var + eps)
    shift = beta - mean * scale
    return scale.astype(jnp.float32), shift.astype(jnp.float32)


def _oihw_to_matrix(w):
    """(Cout, Cin, kh, kw) -> (kh*kw*Cin, Cout), matching patch ordering."""
    cout = w.shape[0]
    return jnp.transpose(w, (2, 3, 1, 0)).reshape(-1, cout).astype(jnp.float32)


@functools.partial(jax.jit, static_argnums=(2,))
def basic_block_forward(x_nchw, params, stride):
    x = jnp.transpose(x_nchw, (0, 2, 3, 1)).astype(jnp.float32)  # NHWC
    N, H, W, Cin = x.shape
    Cout = params["conv1_w"].shape[0]

    # --- conv1 + bn1 + (dropout=id) + relu ---------------------------------
    s1, b1 = _fold_bn(params["bn1_gamma"], params["bn1_beta"],
                      params["bn1_mean"], params["bn1_var"])
    w1 = _oihw_to_matrix(params["conv1_w"]) * s1[None, :]
    p1, (_, Ho, Wo) = _extract_patches_nhwc(x, 3, stride, 1)
    out1 = _matmul_bias_act(p1, w1, b1, relu=True)
    out1_nhwc = out1.reshape(N, Ho, Wo, Cout)

    # --- conv2 + bn2 + (dropout=id) + shortcut + add + relu ----------------
    s2, b2 = _fold_bn(params["bn2_gamma"], params["bn2_beta"],
                      params["bn2_mean"], params["bn2_var"])
    w2 = _oihw_to_matrix(params["conv2_w"]) * s2[None, :]
    p2, _ = _extract_patches_nhwc(out1_nhwc, 3, 1, 1)

    if stride != 1 or Cin != Cout:
        # Projection shortcut (1x1 conv, stride) fused into the conv2 matmul
        # via K-concatenation: one pallas_call computes
        #   [p2 | x_strided] @ [[W2*s2]; [Ws*ss]] + (b2 + bs), then ReLU.
        ss, bs = _fold_bn(params["bns_gamma"], params["bns_beta"],
                          params["bns_mean"], params["bns_var"])
        ws = _oihw_to_matrix(params["short_w"]) * ss[None, :]
        x_sub = x[:, ::stride, ::stride, :]                       # 1x1, stride
        ps = x_sub.reshape(N * Ho * Wo, Cin)
        p_cat = jnp.concatenate([p2, ps], axis=1)
        w_cat = jnp.concatenate([w2, ws], axis=0)
        out2 = _matmul_bias_act(p_cat, w_cat, b2 + bs, relu=True)
    else:
        # Identity shortcut: add x as an f32 residual in the epilogue.
        residual = x.reshape(N * Ho * Wo, Cin)
        out2 = _matmul_bias_act(p2, w2, b2, residual=residual, relu=True)

    out_nhwc = out2.reshape(N, Ho, Wo, Cout)
    return jnp.transpose(out_nhwc, (0, 3, 1, 2))                  # back to NCHW


# ---------------------------------------------------------------------------
# Pure-JAX reference (lax.conv) for correctness check
# ---------------------------------------------------------------------------
def reference_forward(x, params, stride, eps=BN_EPS):
    def conv(inp, w, s, pad):
        return lax.conv_general_dilated(
            inp, w, (s, s), [(pad, pad), (pad, pad)],
            dimension_numbers=("NCHW", "OIHW", "NCHW"))

    def bn(y, g, b, m, v):
        g, b, m, v = (t[None, :, None, None] for t in (g, b, m, v))
        return g * (y - m) / jnp.sqrt(v + eps) + b

    Cin = x.shape[1]
    Cout = params["conv1_w"].shape[0]
    out = jax.nn.relu(bn(conv(x, params["conv1_w"], stride, 1),
                         params["bn1_gamma"], params["bn1_beta"],
                         params["bn1_mean"], params["bn1_var"]))
    out = bn(conv(out, params["conv2_w"], 1, 1),
             params["bn2_gamma"], params["bn2_beta"],
             params["bn2_mean"], params["bn2_var"])
    if stride != 1 or Cin != Cout:
        sc = bn(conv(x, params["short_w"], stride, 0),
                params["bns_gamma"], params["bns_beta"],
                params["bns_mean"], params["bns_var"])
    else:
        sc = x
    return jax.nn.relu(out + sc)


# ---------------------------------------------------------------------------
# Deterministic parameter init + driver
# ---------------------------------------------------------------------------
def init_params(key, in_planes, planes):
    ks = jax.random.split(key, 15)

    def bn_init(kg, kb, km, kv, c):
        return (1.0 + 0.1 * jax.random.normal(kg, (c,), jnp.float32),
                0.1 * jax.random.normal(kb, (c,), jnp.float32),
                0.1 * jax.random.normal(km, (c,), jnp.float32),
                0.5 + 0.5 * jnp.abs(jax.random.normal(kv, (c,), jnp.float32)))

    g1, b1, m1, v1 = bn_init(ks[1], ks[2], ks[3], ks[4], planes)
    g2, b2, m2, v2 = bn_init(ks[6], ks[7], ks[8], ks[9], planes)
    gs, bs, ms, vs = bn_init(ks[11], ks[12], ks[13], ks[14], planes)
    return {
        "conv1_w": 0.1 * jax.random.normal(ks[0], (planes, in_planes, 3, 3),
                                           jnp.float32),
        "bn1_gamma": g1, "bn1_beta": b1, "bn1_mean": m1, "bn1_var": v1,
        "conv2_w": 0.1 * jax.random.normal(ks[5], (planes, planes, 3, 3),
                                           jnp.float32),
        "bn2_gamma": g2, "bn2_beta": b2, "bn2_mean": m2, "bn2_var": v2,
        "short_w": 0.1 * jax.random.normal(ks[10], (planes, in_planes, 1, 1),
                                           jnp.float32),
        "bns_gamma": gs, "bns_beta": bs, "bns_mean": ms, "bns_var": vs,
    }


if __name__ == "__main__":
    in_planes, planes, stride = 4, 8, 2
    key = jax.random.PRNGKey(0)
    kx, kp = jax.random.split(key)
    x = jax.random.normal(kx, (2, in_planes, 16, 16), jnp.float32)   # NCHW
    params = init_params(kp, in_planes, planes)

    out = jax.block_until_ready(basic_block_forward(x, params, stride))
    ref = jax.block_until_ready(reference_forward(x, params, stride))

    assert out.shape == ref.shape == (2, planes, 16 // stride, 16 // stride)
    err = float(jnp.max(jnp.abs(out - ref)))
    # bf16 MXU inputs (f32 accumulation) vs f32 reference -> relaxed tolerance.
    assert err < 3e-2, f"max abs err {err}"

    # Also exercise the identity-shortcut (residual epilogue) path.
    params_id = init_params(kp, planes, planes)
    x_id = jax.random.normal(kx, (2, planes, 16, 16), jnp.float32)
    out_id = jax.block_until_ready(basic_block_forward(x_id, params_id, 1))
    ref_id = jax.block_until_ready(reference_forward(x_id, params_id, 1))
    err_id = float(jnp.max(jnp.abs(out_id - ref_id)))
    assert err_id < 3e-2, f"max abs err (identity shortcut) {err_id}"

    print("KERNEL_OK")
</pallas_src>

<mosaic_0001>
module attributes {stable_mosaic.version = 11 : i64} {
  func.func @_matmul_shift_kernel(%arg0: i32, %arg1: i32, %arg2: i32, %arg3: memref<128x128xbf16, #tpu.memory_space<vmem>>, %arg4: memref<128x128xbf16, #tpu.memory_space<vmem>>, %arg5: memref<1x128xf32, #tpu.memory_space<vmem>>, %arg6: memref<128x128xf32, #tpu.memory_space<vmem>>, %arg7: memref<128x128xf32, #tpu.memory_space<vmem>>) attributes {dimension_semantics = [#tpu.dimension_semantics<parallel>, #tpu.dimension_semantics<parallel>, #tpu.dimension_semantics<arbitrary>], iteration_bounds = array<i64: 1, 1, 1>, scalar_prefetch = 0 : i64, scratch_operands = 1 : i64, tpu.core_type = #tpu.core_type<tc>, window_params = [{transform_indices = @transform_0, window_bounds = array<i64: 128, 128>}, {transform_indices = @transform_1, window_bounds = array<i64: 128, 128>}, {transform_indices = @transform_2, window_bounds = array<i64: 1, 128>}, {transform_indices = @transform_3, window_bounds = array<i64: 128, 128>}]} {
    %c0_i32 = arith.constant 0 : i32
    %0 = arith.cmpi eq, %arg2, %c0_i32 : i32
    %1 = arith.extui %0 : i1 to i32
    %c0_i32_0 = arith.constant 0 : i32
    %2 = arith.cmpi ne, %1, %c0_i32_0 : i32
    scf.if %2 {
      %cst_10 = arith.constant 0.000000e+00 : f32
      %12 = vector.broadcast %cst_10 : f32 to vector<128x128xf32>
      %c0_11 = arith.constant 0 : index
      %c0_12 = arith.constant 0 : index
      %13 = vector.load %arg7[%c0_11, %c0_12] : memref<128x128xf32, #tpu.memory_space<vmem>>, vector<128x128xf32>
      tpu.vector_store %arg7[%c0_11, %c0_12], %12 {strides = array<i32>} : memref<128x128xf32, #tpu.memory_space<vmem>>, vector<128x128xf32>,
    } else {
    }
    %c0 = arith.constant 0 : index
    %c0_1 = arith.constant 0 : index
    %3 = vector.load %arg7[%c0, %c0_1] : memref<128x128xf32, #tpu.memory_space<vmem>>, vector<128x128xf32>
    %c0_2 = arith.constant 0 : index
    %c0_3 = arith.constant 0 : index
    %4 = vector.load %arg3[%c0_2, %c0_3] : memref<128x128xbf16, #tpu.memory_space<vmem>>, vector<128x128xbf16>
    %c0_4 = arith.constant 0 : index
    %c0_5 = arith.constant 0 : index
    %5 = vector.load %arg4[%c0_4, %c0_5] : memref<128x128xbf16, #tpu.memory_space<vmem>>, vector<128x128xbf16>
    %cst = arith.constant dense<0.000000e+00> : vector<128x128xf32>
    %6 = tpu.matmul %4, %5, %cst {dimension_numbers = #tpu.dot_dimension_numbers<[1], [0], [0], [1], [0, 0, 1, 1], [], []>} : vector<128x128xbf16>, vector<128x128xbf16>, vector<128x128xf32> -> vector<128x128xf32>
    %7 = arith.addf %3, %6 : vector<128x128xf32>
    %c0_6 = arith.constant 0 : index
    %c0_7 = arith.constant 0 : index
    %8 = vector.load %arg7[%c0_6, %c0_7] : memref<128x128xf32, #tpu.memory_space<vmem>>, vector<128x128xf32>
    tpu.vector_store %arg7[%c0_6, %c0_7], %7 {strides = array<i32>} : memref<128x128xf32, #tpu.memory_space<vmem>>, vector<128x128xf32>,
    %c0_i32_8 = arith.constant 0 : i32
    %9 = arith.cmpi eq, %arg2, %c0_i32_8 : i32
    %10 = arith.extui %9 : i1 to i32
    %c0_i32_9 = arith.constant 0 : i32
    %11 = arith.cmpi ne, %10, %c0_i32_9 : i32
    scf.if %11 {
      %c0_10 = arith.constant 0 : index
      %c0_11 = arith.constant 0 : index
      %12 = vector.load %arg7[%c0_10, %c0_11] : memref<128x128xf32, #tpu.memory_space<vmem>>, vector<128x128xf32>
      %c0_12 = arith.constant 0 : index
      %c0_13 = arith.constant 0 : index
      %13 = vector.load %arg5[%c0_12, %c0_13] : memref<1x128xf32, #tpu.memory_space<vmem>>, vector<1x128xf32>
      %14 = vector.broadcast %13 : vector<1x128xf32> to vector<128x128xf32>
      %15 = arith.addf %12, %14 : vector<128x128xf32>
      %cst_14 = arith.constant 0.000000e+00 : f32
      %16 = vector.broadcast %cst_14 : f32 to vector<128x128xf32>
      %17 = arith.maximumf %15, %16 : vector<128x128xf32>
      %c0_15 = arith.constant 0 : index
      %c0_16 = arith.constant 0 : index
      %18 = vector.load %arg6[%c0_15, %c0_16] : memref<128x128xf32, #tpu.memory_space<vmem>>, vector<128x128xf32>
      tpu.vector_store %arg6[%c0_15, %c0_16], %17 {strides = array<i32>} : memref<128x128xf32, #tpu.memory_space<vmem>>, vector<128x128xf32>,
    } else {
    }
    return
  }
  func.func @transform_0(%arg0: i32, %arg1: i32, %arg2: i32) -> (i32, i32) {
    %c0_i32 = arith.constant 0 : i32
    return %arg0, %arg2 : i32, i32
  }
  func.func @transform_1(%arg0: i32, %arg1: i32, %arg2: i32) -> (i32, i32) {
    %c0_i32 = arith.constant 0 : i32
    return %arg2, %arg1 : i32, i32
  }
  func.func @transform_2(%arg0: i32, %arg1: i32, %arg2: i32) -> (i32, i32) {
    %c0_i32 = arith.constant 0 : i32
    %c0_i32_0 = arith.constant 0 : i32
    return %c0_i32, %arg1 : i32, i32
  }
  func.func @transform_3(%arg0: i32, %arg1: i32, %arg2: i32) -> (i32, i32) {
    %c0_i32 = arith.constant 0 : i32
    return %arg0, %arg1 : i32, i32
  }
}

module attributes {stable_mosaic.version = 11 : i64} {
  func.func @_matmul_shift_kernel(%arg0: i32, %arg1: i32, %arg2: i32, %arg3: memref<128x128xbf16, #tpu.memory_space<vmem>>, %arg4: memref<128x128xbf16, #tpu.memory_space<vmem>>, %arg5: memref<1x128xf32, #tpu.memory_space<vmem>>, %arg6: memref<128x128xf32, #tpu.memory_space<vmem>>, %arg7: memref<128x128xf32, #tpu.memory_space<vmem>>) attributes {dimension_semantics = [#tpu.dimension_semantics<parallel>, #tpu.dimension_semantics<parallel>, #tpu.dimension_semantics<arbitrary>], iteration_bounds = array<i64: 1, 1, 1>, scalar_prefetch = 0 : i64, scratch_operands = 1 : i64, tpu.core_type = #tpu.core_type<tc>, window_params = [{transform_indices = @transform_0, window_bounds = array<i64: 128, 128>}, {transform_indices = @transform_1, window_bounds = array<i64: 128, 128>}, {transform_indices = @transform_2, window_bounds = array<i64: 1, 128>}, {transform_indices = @transform_3, window_bounds = array<i64: 128, 128>}]} {
    %c0_i32 = arith.constant 0 : i32
    %0 = arith.cmpi eq, %arg2, %c0_i32 : i32
    %1 = arith.extui %0 : i1 to i32
    %c0_i32_0 = arith.constant 0 : i32
    %2 = arith.cmpi ne, %1, %c0_i32_0 : i32
    scf.if %2 {
      %cst_10 = arith.constant 0.000000e+00 : f32
      %12 = vector.broadcast %cst_10 : f32 to vector<128x128xf32>
      %c0_11 = arith.constant 0 : index
      %c0_12 = arith.constant 0 : index
      %13 = vector.load %arg7[%c0_11, %c0_12] : memref<128x128xf32, #tpu.memory_space<vmem>>, vector<128x128xf32>
      tpu.vector_store %arg7[%c0_11, %c0_12], %12 {strides = array<i32>} : memref<128x128xf32, #tpu.memory_space<vmem>>, vector<128x128xf32>,
    } else {
    }
    %c0 = arith.constant 0 : index
    %c0_1 = arith.constant 0 : index
    %3 = vector.load %arg7[%c0, %c0_1] : memref<128x128xf32, #tpu.memory_space<vmem>>, vector<128x128xf32>
    %c0_2 = arith.constant 0 : index
    %c0_3 = arith.constant 0 : index
    %4 = vector.load %arg3[%c0_2, %c0_3] : memref<128x128xbf16, #tpu.memory_space<vmem>>, vector<128x128xbf16>
    %c0_4 = arith.constant 0 : index
    %c0_5 = arith.constant 0 : index
    %5 = vector.load %arg4[%c0_4, %c0_5] : memref<128x128xbf16, #tpu.memory_space<vmem>>, vector<128x128xbf16>
    %cst = arith.constant dense<0.000000e+00> : vector<128x128xf32>
    %6 = tpu.matmul %4, %5, %cst {dimension_numbers = #tpu.dot_dimension_numbers<[1], [0], [0], [1], [0, 0, 1, 1], [], []>} : vector<128x128xbf16>, vector<128x128xbf16>, vector<128x128xf32> -> vector<128x128xf32>
    %7 = arith.addf %3, %6 : vector<128x128xf32>
    %c0_6 = arith.constant 0 : index
    %c0_7 = arith.constant 0 : index
    %8 = vector.load %arg7[%c0_6, %c0_7] : memref<128x128xf32, #tpu.memory_space<vmem>>, vector<128x128xf32>
    tpu.vector_store %arg7[%c0_6, %c0_7], %7 {strides = array<i32>} : memref<128x128xf32, #tpu.memory_space<vmem>>, vector<128x128xf32>,
    %c0_i32_8 = arith.constant 0 : i32
    %9 = arith.cmpi eq, %arg2, %c0_i32_8 : i32
    %10 = arith.extui %9 : i1 to i32
    %c0_i32_9 = arith.constant 0 : i32
    %11 = arith.cmpi ne, %10, %c0_i32_9 : i32
    scf.if %11 {
      %c0_10 = arith.constant 0 : index
      %c0_11 = arith.constant 0 : index
      %12 = vector.load %arg7[%c0_10, %c0_11] : memref<128x128xf32, #tpu.memory_space<vmem>>, vector<128x128xf32>
      %c0_12 = arith.constant 0 : index
      %c0_13 = arith.constant 0 : index
      %13 = vector.load %arg5[%c0_12, %c0_13] : memref<1x128xf32, #tpu.memory_space<vmem>>, vector<1x128xf32>
      %14 = vector.broadcast %13 : vector<1x128xf32> to vector<128x128xf32>
      %15 = arith.addf %12, %14 : vector<128x128xf32>
      %cst_14 = arith.constant 0.000000e+00 : f32
      %16 = vector.broadcast %cst_14 : f32 to vector<128x128xf32>
      %17 = arith.maximumf %15, %16 : vector<128x128xf32>
      %c0_15 = arith.constant 0 : index
      %c0_16 = arith.constant 0 : index
      %18 = vector.load %arg6[%c0_15, %c0_16] : memref<128x128xf32, #tpu.memory_space<vmem>>, vector<128x128xf32>
      tpu.vector_store %arg6[%c0_15, %c0_16], %17 {strides = array<i32>} : memref<128x128xf32, #tpu.memory_space<vmem>>, vector<128x128xf32>,
    } else {
    }
    return
  }
  func.func @transform_0(%arg0: i32, %arg1: i32, %arg2: i32) -> (i32, i32) {
    %c0_i32 = arith.constant 0 : i32
    return %arg0, %arg2 : i32, i32
  }
  func.func @transform_1(%arg0: i32, %arg1: i32, %arg2: i32) -> (i32, i32) {
    %c0_i32 = arith.constant 0 : i32
    return %arg2, %arg1 : i32, i32
  }
  func.func @transform_2(%arg0: i32, %arg1: i32, %arg2: i32) -> (i32, i32) {
    %c0_i32 = arith.constant 0 : i32
    %c0_i32_0 = arith.constant 0 : i32
    return %c0_i32, %arg1 : i32, i32
  }
  func.func @transform_3(%arg0: i32, %arg1: i32, %arg2: i32) -> (i32, i32) {
    %c0_i32 = arith.constant 0 : i32
    return %arg0, %arg1 : i32, i32
  }
}

</mosaic_0001>

<bundles_post_ra>
// kernel: basic_block_forward.4
= control target key start
LH: loop header
LB: loop body
LE: loop exit
PB: predicated region body
PF: predicated region fallthrough
CT: control target
= control target key end

     0   :  { %s1052_s0 = inlined_call_operand.vmem [shape: bf16[128,128], index: 0, kind: input, shape index: {}]   ;;  %s1053_s1 = inlined_call_operand.vmem [shape: f32[1,128], index: 1, kind: input, shape index: {}]   ;;  %s1054_s2 = inlined_call_operand.vmem [shape: bf16[128,36], index: 2, kind: input, shape index: {}]   ;;  %s1055_s3 = inlined_call_operand.<no memory space> [shape: bf16[], index: 3, kind: input, shape index: {}]   ;;  %s1056_s4 = inlined_call_operand.vmem [shape: f32[128,128], index: 4, kind: output, shape index: {}]  }
   0x1   :  { %v9_v0 = vstv %s1055_s3 }
   0x2   :  { %v884_v1 = vunpack.i.l.bf16 %v9_v0 }
   0x3   :  { %v839_v2 = vld [vmem:[%s1052_s0] sm:$0xff]   ;;  %v32_v3 = vlaneseq  ;;  %v840_v4 = vld [vmem:[%s1052_s0 + $0x8] sm:$0xff]   ;;  %v841_v5 = vld [vmem:[%s1052_s0 + $0x10] sm:$0xff]   ;;  %v855_v26 = vmov 0.0  }
   0x4   :  { %790 = vmatprep.subr.bf16.mxu0 %v839_v2  ;;  %822 = vmatprep.subr.bf16.mxu1 %v839_v2  ;;  %v842_v7 = vld [vmem:[%s1052_s0 + $0x18] sm:$0xff]   ;;  %v29_v8 = vld [vmem:[%s1054_s2] sm:$0xff]   ;;  %v743_v10 = vld [vmem:[%s1054_s2 + $0x8] sm:$0xff]  }
   0x5   :  { %791 = vmatpush3.bf16.msra.mxu0 %v839_v2  ;;  %830 = vmatpush3.bf16.msra.mxu1 %v839_v2  ;;  %v895_v6 = vand.u32 127, %v32_v3  ;;  %v749_v9 = vld [vmem:[%s1054_s2 + $0x20] sm:$0xff]   ;;  %v30_v11 = vunpack.c.l.bf16 %v29_v8  ;;  %v51_v12 = vunpack.c.h.bf16 %v29_v8  ;;  %v751_v15 = vld [vmem:[%s1054_s2 + $0x28] sm:$0xff]   ;;  %v745_v16 = vld [vmem:[%s1054_s2 + $0x10] sm:$0xff]   ;;  %v73_v17 = vunpack.c.l.bf16 %v743_v10 }
   0x6   :  { %792 = vmatprep.subr.bf16.mxu0 %v840_v4  ;;  %823 = vmatprep.subr.bf16.mxu1 %v840_v4  ;;  %v205_v13 = vunpack.c.l.bf16 %v749_v9  ;;  %v227_v14 = vunpack.c.h.bf16 %v749_v9  ;;  %v95_v18 = vunpack.c.h.bf16 %v743_v10  ;;  %v249_v19 = vunpack.c.l.bf16 %v751_v15  ;;  %v843_v25 = vld [vmem:[%s1052_s0 + $0x20] sm:$0xff]   ;;  %v753_v31 = vld [vmem:[%s1054_s2 + $0x30] sm:$0xff]   ;;  %v747_v40 = vld [vmem:[%s1054_s2 + $0x18] sm:$0xff]  }
   0x7   :  { %vm35_vm0 = vcmp.lt.s32.totalorder %v895_v6, 36  ;;  %v271_v20 = vunpack.c.h.bf16 %v751_v15  ;;  %v117_v24 = vunpack.c.l.bf16 %v745_v16  ;;  %v139_v30 = vunpack.c.h.bf16 %v745_v16  ;;  %v755_v41 = vld [vmem:[%s1054_s2 + $0x38] sm:$0xff]   ;;  %v844_v46 = vld [vmem:[%s1052_s0 + $0x28] sm:$0xff]   ;;  %v845_v61 = vld [vmem:[%s1052_s0 + $0x30] sm:$0xff]  }
   0x8   :  { %v36_v21 = vsel %vm35_vm0, %v30_v11, %v884_v1  ;;  %v57_v22 = vsel %vm35_vm0, %v51_v12, %v884_v1  ;;  %v211_v23 = vsel %vm35_vm0, %v205_v13, %v884_v1  ;;  %v233_v32 = vsel %vm35_vm0, %v227_v14, %v884_v1  ;;  %v846_v8 = vld [vmem:[%s1052_s0 + $0x38] sm:$0xff]   ;;  %v773_v13 = vld [vmem:[%s1053_s1] ss:$0 sm:$0xff] }
   0x9   :  { %793 = vmatpush3.bf16.msra.mxu0 %v840_v4  ;;  %831 = vmatpush3.bf16.msra.mxu1 %v840_v4  ;;  %v37_v27 = vpack.c.bf16 %v855_v26, %v36_v21  ;;  %v59_v28 = vpack.c.bf16 %v855_v26, %v57_v22  ;;  %v213_v29 = vpack.c.bf16 %v855_v26, %v211_v23  ;;  %v293_v45 = vunpack.c.l.bf16 %v753_v31 }
   0xa   :  { %794 = vmatprep.subr.bf16.mxu0 %v841_v5  ;;  %824 = vmatprep.subr.bf16.mxu1 %v841_v5  ;;  %v79_v33 = vsel %vm35_vm0, %v73_v17, %v884_v1  ;;  %v101_v34 = vsel %vm35_vm0, %v95_v18, %v884_v1  ;;  %v255_v35 = vsel %vm35_vm0, %v249_v19, %v884_v1  ;;  %v315_v50 = vunpack.c.h.bf16 %v753_v31 }
   0xb   :  { %39 = vst [vmem:[#allocation8] sm:$0xf] %v37_v27  ;;  %61 = vst [vmem:[#allocation8 + $0x4] sm:$0xf] %v59_v28  ;;  %v235_v36 = vpack.c.bf16 %v855_v26, %v233_v32  ;;  %v81_v37 = vpack.c.bf16 %v855_v26, %v79_v33  ;;  %v103_v38 = vpack.c.bf16 %v855_v26, %v101_v34  ;;  %v161_v52 = vunpack.c.l.bf16 %v747_v40 }
   0xc   :  { %215 = vst [vmem:[#allocation8 + $0x20] sm:$0xf] %v213_v29  ;;  %v257_v39 = vpack.c.bf16 %v855_v26, %v255_v35  ;;  %v277_v42 = vsel %vm35_vm0, %v271_v20, %v884_v1  ;;  %v123_v43 = vsel %vm35_vm0, %v117_v24, %v884_v1  ;;  %v145_v44 = vsel %vm35_vm0, %v139_v30, %v884_v1 }
   0xd   :  { %795 = vmatpush3.bf16.msra.mxu0 %v841_v5  ;;  %832 = vmatpush3.bf16.msra.mxu1 %v841_v5  ;;  %237 = vst [vmem:[#allocation8 + $0x24] sm:$0xf] %v235_v36  ;;  %83 = vst [vmem:[#allocation8 + $0x8] sm:$0xf] %v81_v37  ;;  %v279_v47 = vpack.c.bf16 %v855_v26, %v277_v42  ;;  %v125_v48 = vpack.c.bf16 %v855_v26, %v123_v43  ;;  %v183_v53 = vunpack.c.h.bf16 %v747_v40 }
   0xe   :  { %796 = vmatprep.subr.bf16.mxu0 %v842_v7  ;;  %825 = vmatprep.subr.bf16.mxu1 %v842_v7  ;;  %105 = vst [vmem:[#allocation8 + $0xc] sm:$0xf] %v103_v38  ;;  %259 = vst [vmem:[#allocation8 + $0x28] sm:$0xf] %v257_v39  ;;  %v147_v49 = vpack.c.bf16 %v855_v26, %v145_v44  ;;  %v299_v51 = vsel %vm35_vm0, %v293_v45, %v884_v1  ;;  %v337_v54 = vunpack.c.l.bf16 %v755_v41 }
   0xf   :  { %281 = vst [vmem:[#allocation8 + $0x2c] sm:$0xf] %v279_v47  ;;  %127 = vst [vmem:[#allocation8 + $0x10] sm:$0xf] %v125_v48  ;;  %v301_v55 = vpack.c.bf16 %v855_v26, %v299_v51  ;;  %v321_v56 = vsel %vm35_vm0, %v315_v50, %v884_v1  ;;  %v359_v57 = vunpack.c.h.bf16 %v755_v41  ;;  %v167_v59 = vsel %vm35_vm0, %v161_v52, %v884_v1 }
  0x10   :  { %149 = vst [vmem:[#allocation8 + $0x14] sm:$0xf] %v147_v49  ;;  %v323_v58 = vpack.c.bf16 %v855_v26, %v321_v56  ;;  %v189_v60 = vsel %vm35_vm0, %v183_v53, %v884_v1  ;;  %v169_v62 = vpack.c.bf16 %v855_v26, %v167_v59  ;;  %v343_v0 = vsel %vm35_vm0, %v337_v54, %v884_v1 }
  0x11   :  { %797 = vmatpush3.bf16.msra.mxu0 %v842_v7  ;;  %833 = vmatpush3.bf16.msra.mxu1 %v842_v7  ;;  %303 = vst [vmem:[#allocation8 + $0x30] sm:$0xf] %v301_v55  ;;  %v191_v63 = vpack.c.bf16 %v855_v26, %v189_v60  ;;  %v345_v3 = vpack.c.bf16 %v855_v26, %v343_v0 }
  0x12   :  { %798 = vmatprep.subr.bf16.mxu0 %v843_v25  ;;  %826 = vmatprep.subr.bf16.mxu1 %v843_v25  ;;  %v847_v2 = vld [vmem:[#allocation8] sm:$0xff]   ;;  %325 = vst [vmem:[#allocation8 + $0x34] sm:$0xf] %v323_v58  ;;  %v365_v4 = vsel %vm35_vm0, %v359_v57, %v884_v1  ;;  %171 = vst [vmem:[#allocation8 + $0x18] sm:$0xf] %v169_v62 }
  0x13   :  { %193 = vst [vmem:[#allocation8 + $0x1c] sm:$0xf] %v191_v63  ;;  %v367_v5 = vpack.c.bf16 %v855_v26, %v365_v4  ;;  %347 = vst [vmem:[#allocation8 + $0x38] sm:$0xf] %v345_v3  ;;  %806 = vmatprep.mubr.bf16.mxu0 %v847_v2 }
  0x14   :  { %v848_v7 = vld [vmem:[#allocation8 + $0x20] sm:$0xff]  }
  0x15   :  { %799 = vmatpush3.bf16.msra.mxu0 %v843_v25  ;;  %834 = vmatpush3.bf16.msra.mxu1 %v843_v25  ;;  %369 = vst [vmem:[#allocation8 + $0x3c] sm:$0xf] %v367_v5  ;;  %v849_v1 = vld [vmem:[#allocation8 + $0x8] sm:$0xff]  }
  0x16   :  { %800 = vmatprep.subr.bf16.mxu0 %v844_v46  ;;  %827 = vmatprep.subr.bf16.mxu1 %v844_v46  ;;  %v850_v6 = vld [vmem:[#allocation8 + $0x28] sm:$0xff]  }
  0x17   :  { %814 = vmatprep.mubr.bf16.mxu1 %v848_v7  ;;  %v851_v9 = vld [vmem:[#allocation8 + $0x10] sm:$0xff]  }
  0x19   :  { %801 = vmatpush3.bf16.msra.mxu0 %v844_v46  ;;  %835 = vmatpush3.bf16.msra.mxu1 %v844_v46  ;;  %v852_v10 = vld [vmem:[#allocation8 + $0x30] sm:$0xff]  }
  0x1a   :  { %802 = vmatprep.subr.bf16.mxu0 %v845_v61  ;;  %828 = vmatprep.subr.bf16.mxu1 %v845_v61  ;;  %v853_v11 = vld [vmem:[#allocation8 + $0x18] sm:$0xff]  }
  0x1c   :  { %v854_v12 = vld [vmem:[#allocation8 + $0x38] sm:$0xff]  }
  0x1d   :  { %803 = vmatpush3.bf16.msra.mxu0 %v845_v61  ;;  %836 = vmatpush3.bf16.msra.mxu1 %v845_v61 }
  0x1e   :  { %804 = vmatprep.subr.bf16.mxu0 %v846_v8  ;;  %829 = vmatprep.subr.bf16.mxu1 %v846_v8 }
  0x21   :  { %805 = vmatpush3.bf16.msra.mxu0 %v846_v8  ;;  %837 = vmatpush3.bf16.msra.mxu1 %v846_v8 }
  0x24   :  { %807 = vmatmul.mubr.bf16.vlgmr.msra.gmra.mrb[0].mxu0 %v849_v1  ;;  %815 = vmatmul.mubr.bf16.vlgmr.msra.gmra.mrb[0].mxu1 %v850_v6 }
  0x25   :  { %810 = vmatprep.mubr.bf16.mxu0 %v851_v9  ;;  %818 = vmatprep.mubr.bf16.mxu1 %v852_v10 }
  0x2c   :  { %811 = vmatmul.mubr.bf16.gmra.mrb[4].mxu0 %v853_v11  ;;  %819 = vmatmul.mubr.bf16.gmra.mrb[4].mxu1 %v854_v12 }
  0xf7   :  { %v808_v14 = vpop.f32.mrb[0].mxu0  ;;  %v816_v15 = vpop.f32.mrb[0].mxu1 }
  0xf8   :  { %v692_v16 = vadd.f32 %v808_v14, %v773_v13  ;;  %v700_v17 = vadd.f32 %v816_v15, %v773_v13  ;;  %v569_v18 = vpop.f32.mrb[1].mxu0  ;;  %v601_v19 = vpop.f32.mrb[1].mxu1 }
  0xf9   :  { %v690_v20 = vadd.f32 %v773_v13, %v569_v18  ;;  %v698_v21 = vadd.f32 %v773_v13, %v601_v19  ;;  %v809_v22 = vpop.f32.mrb[2].mxu0  ;;  %v817_v23 = vpop.f32.mrb[2].mxu1 }
  0xfa   :  { %v708_v24 = vmax.f32 %v692_v16, 0.0  ;;  %v716_v25 = vmax.f32 %v700_v17, 0.0  ;;  %v693_v26 = vadd.f32 %v809_v22, %v773_v13  ;;  %v701_v27 = vadd.f32 %v817_v23, %v773_v13  ;;  %v572_v28 = vpop.f32.mrb[3].mxu0  ;;  %v604_v29 = vpop.f32.mrb[3].mxu1 }
  0xfb   :  { %v706_v30 = vmax.f32 %v690_v20, 0.0  ;;  %v714_v31 = vmax.f32 %v698_v21, 0.0  ;;  %v691_v32 = vadd.f32 %v773_v13, %v572_v28  ;;  %v699_v33 = vadd.f32 %v773_v13, %v604_v29 }
  0xfc   :  { %724 = vst [vmem:[%s1056_s4 + $0x10] sm:$0xff] %v708_v24  ;;  %732 = vst [vmem:[%s1056_s4 + $0x50] sm:$0xff] %v716_v25  ;;  %v709_v34 = vmax.f32 %v693_v26, 0.0  ;;  %v717_v35 = vmax.f32 %v701_v27, 0.0 }
  0xfd   :  { %722 = vst [vmem:[%s1056_s4] sm:$0xff] %v706_v30  ;;  %730 = vst [vmem:[%s1056_s4 + $0x40] sm:$0xff] %v714_v31  ;;  %v707_v36 = vmax.f32 %v691_v32, 0.0  ;;  %v715_v37 = vmax.f32 %v699_v33, 0.0 }
  0xfe   :  { %725 = vst [vmem:[%s1056_s4 + $0x18] sm:$0xff] %v709_v34  ;;  %733 = vst [vmem:[%s1056_s4 + $0x58] sm:$0xff] %v717_v35 }
  0xff   :  { %723 = vst [vmem:[%s1056_s4 + $0x8] sm:$0xff] %v707_v36  ;;  %731 = vst [vmem:[%s1056_s4 + $0x48] sm:$0xff] %v715_v37  ;;  %v812_v38 = vpop.f32.mrb[4].mxu0  ;;  %v820_v39 = vpop.f32.mrb[4].mxu1 }
 0x100   :  { %v696_v40 = vadd.f32 %v812_v38, %v773_v13  ;;  %v704_v41 = vadd.f32 %v820_v39, %v773_v13  ;;  %v585_v42 = vpop.f32.mrb[5].mxu0  ;;  %v617_v43 = vpop.f32.mrb[5].mxu1 }
 0x101   :  { %v694_v44 = vadd.f32 %v773_v13, %v585_v42  ;;  %v702_v45 = vadd.f32 %v773_v13, %v617_v43  ;;  %v813_v46 = vpop.f32.mrb[6].mxu0  ;;  %v821_v47 = vpop.f32.mrb[6].mxu1 }
 0x102   :  { %v712_v48 = vmax.f32 %v696_v40, 0.0  ;;  %v720_v49 = vmax.f32 %v704_v41, 0.0  ;;  %v697_v50 = vadd.f32 %v813_v46, %v773_v13  ;;  %v705_v51 = vadd.f32 %v821_v47, %v773_v13  ;;  %v588_v52 = vpop.f32.mrb[7].mxu0  ;;  %v620_v53 = vpop.f32.mrb[7].mxu1 }
 0x103   :  { %v710_v54 = vmax.f32 %v694_v44, 0.0  ;;  %v718_v55 = vmax.f32 %v702_v45, 0.0  ;;  %v695_v56 = vadd.f32 %v773_v13, %v588_v52  ;;  %v703_v57 = vadd.f32 %v773_v13, %v620_v53 }
 0x104   :  { %728 = vst [vmem:[%s1056_s4 + $0x30] sm:$0xff] %v712_v48  ;;  %736 = vst [vmem:[%s1056_s4 + $0x70] sm:$0xff] %v720_v49  ;;  %v713_v58 = vmax.f32 %v697_v50, 0.0  ;;  %v721_v59 = vmax.f32 %v705_v51, 0.0 }
 0x105   :  { %726 = vst [vmem:[%s1056_s4 + $0x20] sm:$0xff] %v710_v54  ;;  %734 = vst [vmem:[%s1056_s4 + $0x60] sm:$0xff] %v718_v55  ;;  %v711_v60 = vmax.f32 %v695_v56, 0.0  ;;  %v719_v61 = vmax.f32 %v703_v57, 0.0 }
 0x106   :  { %729 = vst [vmem:[%s1056_s4 + $0x38] sm:$0xff] %v713_v58  ;;  %737 = vst [vmem:[%s1056_s4 + $0x78] sm:$0xff] %v721_v59 }
 0x107   :  { %727 = vst [vmem:[%s1056_s4 + $0x28] sm:$0xff] %v711_v60  ;;  %735 = vst [vmem:[%s1056_s4 + $0x68] sm:$0xff] %v719_v61 }

// kernel: basic_block_forward.5
= control target key start
LH: loop header
LB: loop body
LE: loop exit
PB: predicated region body
PF: predicated region fallthrough
CT: control target
= control target key end

     0   :  { %s1052_s0 = inlined_call_operand.vmem [shape: bf16[128,128], index: 0, kind: input, shape index: {}]   ;;  %s1053_s1 = inlined_call_operand.vmem [shape: f32[1,128], index: 1, kind: input, shape index: {}]   ;;  %s1054_s2 = inlined_call_operand.vmem [shape: bf16[128,76], index: 2, kind: input, shape index: {}]   ;;  %s1055_s3 = inlined_call_operand.<no memory space> [shape: bf16[], index: 3, kind: input, shape index: {}]   ;;  %s1056_s4 = inlined_call_operand.vmem [shape: f32[128,128], index: 4, kind: output, shape index: {}]  }
   0x1   :  { %v9_v0 = vstv %s1055_s3 }
   0x2   :  { %v884_v1 = vunpack.i.l.bf16 %v9_v0 }
   0x3   :  { %v839_v2 = vld [vmem:[%s1052_s0] sm:$0xff]   ;;  %v32_v3 = vlaneseq  ;;  %v840_v4 = vld [vmem:[%s1052_s0 + $0x8] sm:$0xff]   ;;  %v841_v5 = vld [vmem:[%s1052_s0 + $0x10] sm:$0xff]   ;;  %v855_v26 = vmov 0.0  }
   0x4   :  { %790 = vmatprep.subr.bf16.mxu0 %v839_v2  ;;  %822 = vmatprep.subr.bf16.mxu1 %v839_v2  ;;  %v842_v7 = vld [vmem:[%s1052_s0 + $0x18] sm:$0xff]   ;;  %v29_v8 = vld [vmem:[%s1054_s2] sm:$0xff]   ;;  %v743_v10 = vld [vmem:[%s1054_s2 + $0x8] sm:$0xff]  }
   0x5   :  { %791 = vmatpush3.bf16.msra.mxu0 %v839_v2  ;;  %830 = vmatpush3.bf16.msra.mxu1 %v839_v2  ;;  %v895_v6 = vand.u32 127, %v32_v3  ;;  %v749_v9 = vld [vmem:[%s1054_s2 + $0x20] sm:$0xff]   ;;  %v30_v11 = vunpack.c.l.bf16 %v29_v8  ;;  %v51_v12 = vunpack.c.h.bf16 %v29_v8  ;;  %v751_v15 = vld [vmem:[%s1054_s2 + $0x28] sm:$0xff]   ;;  %v745_v16 = vld [vmem:[%s1054_s2 + $0x10] sm:$0xff]   ;;  %v73_v17 = vunpack.c.l.bf16 %v743_v10 }
   0x6   :  { %792 = vmatprep.subr.bf16.mxu0 %v840_v4  ;;  %823 = vmatprep.subr.bf16.mxu1 %v840_v4  ;;  %v205_v13 = vunpack.c.l.bf16 %v749_v9  ;;  %v227_v14 = vunpack.c.h.bf16 %v749_v9  ;;  %v95_v18 = vunpack.c.h.bf16 %v743_v10  ;;  %v249_v19 = vunpack.c.l.bf16 %v751_v15  ;;  %v843_v25 = vld [vmem:[%s1052_s0 + $0x20] sm:$0xff]   ;;  %v753_v31 = vld [vmem:[%s1054_s2 + $0x30] sm:$0xff]   ;;  %v747_v40 = vld [vmem:[%s1054_s2 + $0x18] sm:$0xff]  }
   0x7   :  { %vm35_vm0 = vcmp.lt.s32.totalorder %v895_v6, 76  ;;  %v271_v20 = vunpack.c.h.bf16 %v751_v15  ;;  %v117_v24 = vunpack.c.l.bf16 %v745_v16  ;;  %v139_v30 = vunpack.c.h.bf16 %v745_v16  ;;  %v755_v41 = vld [vmem:[%s1054_s2 + $0x38] sm:$0xff]   ;;  %v844_v46 = vld [vmem:[%s1052_s0 + $0x28] sm:$0xff]   ;;  %v845_v61 = vld [vmem:[%s1052_s0 + $0x30] sm:$0xff]  }
   0x8   :  { %v36_v21 = vsel %vm35_vm0, %v30_v11, %v884_v1  ;;  %v57_v22 = vsel %vm35_vm0, %v51_v12, %v884_v1  ;;  %v211_v23 = vsel %vm35_vm0, %v205_v13, %v884_v1  ;;  %v233_v32 = vsel %vm35_vm0, %v227_v14, %v884_v1  ;;  %v846_v8 = vld [vmem:[%s1052_s0 + $0x38] sm:$0xff]   ;;  %v773_v13 = vld [vmem:[%s1053_s1] ss:$0 sm:$0xff] }
   0x9   :  { %793 = vmatpush3.bf16.msra.mxu0 %v840_v4  ;;  %831 = vmatpush3.bf16.msra.mxu1 %v840_v4  ;;  %v37_v27 = vpack.c.bf16 %v855_v26, %v36_v21  ;;  %v59_v28 = vpack.c.bf16 %v855_v26, %v57_v22  ;;  %v213_v29 = vpack.c.bf16 %v855_v26, %v211_v23  ;;  %v293_v45 = vunpack.c.l.bf16 %v753_v31 }
   0xa   :  { %794 = vmatprep.subr.bf16.mxu0 %v841_v5  ;;  %824 = vmatprep.subr.bf16.mxu1 %v841_v5  ;;  %v79_v33 = vsel %vm35_vm0, %v73_v17, %v884_v1  ;;  %v101_v34 = vsel %vm35_vm0, %v95_v18, %v884_v1  ;;  %v255_v35 = vsel %vm35_vm0, %v249_v19, %v884_v1  ;;  %v315_v50 = vunpack.c.h.bf16 %v753_v31 }
   0xb   :  { %39 = vst [vmem:[#allocation8] sm:$0xf] %v37_v27  ;;  %61 = vst [vmem:[#allocation8 + $0x4] sm:$0xf] %v59_v28  ;;  %v235_v36 = vpack.c.bf16 %v855_v26, %v233_v32  ;;  %v81_v37 = vpack.c.bf16 %v855_v26, %v79_v33  ;;  %v103_v38 = vpack.c.bf16 %v855_v26, %v101_v34  ;;  %v161_v52 = vunpack.c.l.bf16 %v747_v40 }
   0xc   :  { %215 = vst [vmem:[#allocation8 + $0x20] sm:$0xf] %v213_v29  ;;  %v257_v39 = vpack.c.bf16 %v855_v26, %v255_v35  ;;  %v277_v42 = vsel %vm35_vm0, %v271_v20, %v884_v1  ;;  %v123_v43 = vsel %vm35_vm0, %v117_v24, %v884_v1  ;;  %v145_v44 = vsel %vm35_vm0, %v139_v30, %v884_v1 }
   0xd   :  { %795 = vmatpush3.bf16.msra.mxu0 %v841_v5  ;;  %832 = vmatpush3.bf16.msra.mxu1 %v841_v5  ;;  %237 = vst [vmem:[#allocation8 + $0x24] sm:$0xf] %v235_v36  ;;  %83 = vst [vmem:[#allocation8 + $0x8] sm:$0xf] %v81_v37  ;;  %v279_v47 = vpack.c.bf16 %v855_v26, %v277_v42  ;;  %v125_v48 = vpack.c.bf16 %v855_v26, %v123_v43  ;;  %v183_v53 = vunpack.c.h.bf16 %v747_v40 }
   0xe   :  { %796 = vmatprep.subr.bf16.mxu0 %v842_v7  ;;  %825 = vmatprep.subr.bf16.mxu1 %v842_v7  ;;  %105 = vst [vmem:[#allocation8 + $0xc] sm:$0xf] %v103_v38  ;;  %259 = vst [vmem:[#allocation8 + $0x28] sm:$0xf] %v257_v39  ;;  %v147_v49 = vpack.c.bf16 %v855_v26, %v145_v44  ;;  %v299_v51 = vsel %vm35_vm0, %v293_v45, %v884_v1  ;;  %v337_v54 = vunpack.c.l.bf16 %v755_v41 }
   0xf   :  { %281 = vst [vmem:[#allocation8 + $0x2c] sm:$0xf] %v279_v47  ;;  %127 = vst [vmem:[#allocation8 + $0x10] sm:$0xf] %v125_v48  ;;  %v301_v55 = vpack.c.bf16 %v855_v26, %v299_v51  ;;  %v321_v56 = vsel %vm35_vm0, %v315_v50, %v884_v1  ;;  %v359_v57 = vunpack.c.h.bf16 %v755_v41  ;;  %v167_v59 = vsel %vm35_vm0, %v161_v52, %v884_v1 }
  0x10   :  { %149 = vst [vmem:[#allocation8 + $0x14] sm:$0xf] %v147_v49  ;;  %v323_v58 = vpack.c.bf16 %v855_v26, %v321_v56  ;;  %v189_v60 = vsel %vm35_vm0, %v183_v53, %v884_v1  ;;  %v169_v62 = vpack.c.bf16 %v855_v26, %v167_v59  ;;  %v343_v0 = vsel %vm35_vm0, %v337_v54, %v884_v1 }
  0x11   :  { %797 = vmatpush3.bf16.msra.mxu0 %v842_v7  ;;  %833 = vmatpush3.bf16.msra.mxu1 %v842_v7  ;;  %303 = vst [vmem:[#allocation8 + $0x30] sm:$0xf] %v301_v55  ;;  %v191_v63 = vpack.c.bf16 %v855_v26, %v189_v60  ;;  %v345_v3 = vpack.c.bf16 %v855_v26, %v343_v0 }
  0x12   :  { %798 = vmatprep.subr.bf16.mxu0 %v843_v25  ;;  %826 = vmatprep.subr.bf16.mxu1 %v843_v25  ;;  %v847_v2 = vld [vmem:[#allocation8] sm:$0xff]   ;;  %325 = vst [vmem:[#allocation8 + $0x34] sm:$0xf] %v323_v58  ;;  %v365_v4 = vsel %vm35_vm0, %v359_v57, %v884_v1  ;;  %171 = vst [vmem:[#allocation8 + $0x18] sm:$0xf] %v169_v62 }
  0x13   :  { %193 = vst [vmem:[#allocation8 + $0x1c] sm:$0xf] %v191_v63  ;;  %v367_v5 = vpack.c.bf16 %v855_v26, %v365_v4  ;;  %347 = vst [vmem:[#allocation8 + $0x38] sm:$0xf] %v345_v3  ;;  %806 = vmatprep.mubr.bf16.mxu0 %v847_v2 }
  0x14   :  { %v848_v7 = vld [vmem:[#allocation8 + $0x20] sm:$0xff]  }
  0x15   :  { %799 = vmatpush3.bf16.msra.mxu0 %v843_v25  ;;  %834 = vmatpush3.bf16.msra.mxu1 %v843_v25  ;;  %369 = vst [vmem:[#allocation8 + $0x3c] sm:$0xf] %v367_v5  ;;  %v849_v1 = vld [vmem:[#allocation8 + $0x8] sm:$0xff]  }
  0x16   :  { %800 = vmatprep.subr.bf16.mxu0 %v844_v46  ;;  %827 = vmatprep.subr.bf16.mxu1 %v844_v46  ;;  %v850_v6 = vld [vmem:[#allocation8 + $0x28] sm:$0xff]  }
  0x17   :  { %814 = vmatprep.mubr.bf16.mxu1 %v848_v7  ;;  %v851_v9 = vld [vmem:[#allocation8 + $0x10] sm:$0xff]  }
  0x19   :  { %801 = vmatpush3.bf16.msra.mxu0 %v844_v46  ;;  %835 = vmatpush3.bf16.msra.mxu1 %v844_v46  ;;  %v852_v10 = vld [vmem:[#allocation8 + $0x30] sm:$0xff]  }
  0x1a   :  { %802 = vmatprep.subr.bf16.mxu0 %v845_v61  ;;  %828 = vmatprep.subr.bf16.mxu1 %v845_v61  ;;  %v853_v11 = vld [vmem:[#allocation8 + $0x18] sm:$0xff]  }
  0x1c   :  { %v854_v12 = vld [vmem:[#allocation8 + $0x38] sm:$0xff]  }
  0x1d   :  { %803 = vmatpush3.bf16.msra.mxu0 %v845_v61  ;;  %836 = vmatpush3.bf16.msra.mxu1 %v845_v61 }
  0x1e   :  { %804 = vmatprep.subr.bf16.mxu0 %v846_v8  ;;  %829 = vmatprep.subr.bf16.mxu1 %v846_v8 }
  0x21   :  { %805 = vmatpush3.bf16.msra.mxu0 %v846_v8  ;;  %837 = vmatpush3.bf16.msra.mxu1 %v846_v8 }
  0x24   :  { %807 = vmatmul.mubr.bf16.vlgmr.msra.gmra.mrb[0].mxu0 %v849_v1  ;;  %815 = vmatmul.mubr.bf16.vlgmr.msra.gmra.mrb[0].mxu1 %v850_v6 }
  0x25   :  { %810 = vmatprep.mubr.bf16.mxu0 %v851_v9  ;;  %818 = vmatprep.mubr.bf16.mxu1 %v852_v10 }
  0x2c   :  { %811 = vmatmul.mubr.bf16.gmra.mrb[4].mxu0 %v853_v11  ;;  %819 = vmatmul.mubr.bf16.gmra.mrb[4].mxu1 %v854_v12 }
  0xf7   :  { %v808_v14 = vpop.f32.mrb[0].mxu0  ;;  %v816_v15 = vpop.f32.mrb[0].mxu1 }
  0xf8   :  { %v692_v16 = vadd.f32 %v808_v14, %v773_v13  ;;  %v700_v17 = vadd.f32 %v816_v15, %v773_v13  ;;  %v569_v18 = vpop.f32.mrb[1].mxu0  ;;  %v601_v19 = vpop.f32.mrb[1].mxu1 }
  0xf9   :  { %v690_v20 = vadd.f32 %v773_v13, %v569_v18  ;;  %v698_v21 = vadd.f32 %v773_v13, %v601_v19  ;;  %v809_v22 = vpop.f32.mrb[2].mxu0  ;;  %v817_v23 = vpop.f32.mrb[2].mxu1 }
  0xfa   :  { %v708_v24 = vmax.f32 %v692_v16, 0.0  ;;  %v716_v25 = vmax.f32 %v700_v17, 0.0  ;;  %v693_v26 = vadd.f32 %v809_v22, %v773_v13  ;;  %v701_v27 = vadd.f32 %v817_v23, %v773_v13  ;;  %v572_v28 = vpop.f32.mrb[3].mxu0  ;;  %v604_v29 = vpop.f32.mrb[3].mxu1 }
  0xfb   :  { %v706_v30 = vmax.f32 %v690_v20, 0.0  ;;  %v714_v31 = vmax.f32 %v698_v21, 0.0  ;;  %v691_v32 = vadd.f32 %v773_v13, %v572_v28  ;;  %v699_v33 = vadd.f32 %v773_v13, %v604_v29 }
  0xfc   :  { %724 = vst [vmem:[%s1056_s4 + $0x10] sm:$0xff] %v708_v24  ;;  %732 = vst [vmem:[%s1056_s4 + $0x50] sm:$0xff] %v716_v25  ;;  %v709_v34 = vmax.f32 %v693_v26, 0.0  ;;  %v717_v35 = vmax.f32 %v701_v27, 0.0 }
  0xfd   :  { %722 = vst [vmem:[%s1056_s4] sm:$0xff] %v706_v30  ;;  %730 = vst [vmem:[%s1056_s4 + $0x40] sm:$0xff] %v714_v31  ;;  %v707_v36 = vmax.f32 %v691_v32, 0.0  ;;  %v715_v37 = vmax.f32 %v699_v33, 0.0 }
  0xfe   :  { %725 = vst [vmem:[%s1056_s4 + $0x18] sm:$0xff] %v709_v34  ;;  %733 = vst [vmem:[%s1056_s4 + $0x58] sm:$0xff] %v717_v35 }
  0xff   :  { %723 = vst [vmem:[%s1056_s4 + $0x8] sm:$0xff] %v707_v36  ;;  %731 = vst [vmem:[%s1056_s4 + $0x48] sm:$0xff] %v715_v37  ;;  %v812_v38 = vpop.f32.mrb[4].mxu0  ;;  %v820_v39 = vpop.f32.mrb[4].mxu1 }
 0x100   :  { %v696_v40 = vadd.f32 %v812_v38, %v773_v13  ;;  %v704_v41 = vadd.f32 %v820_v39, %v773_v13  ;;  %v585_v42 = vpop.f32.mrb[5].mxu0  ;;  %v617_v43 = vpop.f32.mrb[5].mxu1 }
 0x101   :  { %v694_v44 = vadd.f32 %v773_v13, %v585_v42  ;;  %v702_v45 = vadd.f32 %v773_v13, %v617_v43  ;;  %v813_v46 = vpop.f32.mrb[6].mxu0  ;;  %v821_v47 = vpop.f32.mrb[6].mxu1 }
 0x102   :  { %v712_v48 = vmax.f32 %v696_v40, 0.0  ;;  %v720_v49 = vmax.f32 %v704_v41, 0.0  ;;  %v697_v50 = vadd.f32 %v813_v46, %v773_v13  ;;  %v705_v51 = vadd.f32 %v821_v47, %v773_v13  ;;  %v588_v52 = vpop.f32.mrb[7].mxu0  ;;  %v620_v53 = vpop.f32.mrb[7].mxu1 }
 0x103   :  { %v710_v54 = vmax.f32 %v694_v44, 0.0  ;;  %v718_v55 = vmax.f32 %v702_v45, 0.0  ;;  %v695_v56 = vadd.f32 %v773_v13, %v588_v52  ;;  %v703_v57 = vadd.f32 %v773_v13, %v620_v53 }
 0x104   :  { %728 = vst [vmem:[%s1056_s4 + $0x30] sm:$0xff] %v712_v48  ;;  %736 = vst [vmem:[%s1056_s4 + $0x70] sm:$0xff] %v720_v49  ;;  %v713_v58 = vmax.f32 %v697_v50, 0.0  ;;  %v721_v59 = vmax.f32 %v705_v51, 0.0 }
 0x105   :  { %726 = vst [vmem:[%s1056_s4 + $0x20] sm:$0xff] %v710_v54  ;;  %734 = vst [vmem:[%s1056_s4 + $0x60] sm:$0xff] %v718_v55  ;;  %v711_v60 = vmax.f32 %v695_v56, 0.0  ;;  %v719_v61 = vmax.f32 %v703_v57, 0.0 }
 0x106   :  { %729 = vst [vmem:[%s1056_s4 + $0x38] sm:$0xff] %v713_v58  ;;  %737 = vst [vmem:[%s1056_s4 + $0x78] sm:$0xff] %v721_v59 }
 0x107   :  { %727 = vst [vmem:[%s1056_s4 + $0x28] sm:$0xff] %v711_v60  ;;  %735 = vst [vmem:[%s1056_s4 + $0x68] sm:$0xff] %v719_v61 }

</bundles_post_ra>
